<compile_context>
chip_gen: v7x
topology: tpu7x:2x2x1
jax: 0.10.0
libtpu: 0.0.40
codegen_flags: <defaults>
</compile_context>

<pallas_src>
import functools

import jax
import jax.numpy as jnp
from jax.experimental import pallas as pl
from jax.experimental.pallas import tpu as pltpu

IN_DIM = 198    # board features
HID_DIM = 80
OUT_DIM = 1

HID_PAD = 128   # 80 -> 1 lane width (zero-padded; exact math, see below)


def network_kernel(x_ref, w1_ref, b1_ref, w2_ref, b2_ref, o_ref):
    # In-kernel f32->bf16 cast of x (avoids a separate wrapper-side HBM pass).
    x = x_ref[...].astype(jnp.bfloat16)
    # Hidden layer: (TB, 198) bf16 @ (198, 128) bf16 on the MXU, f32 accumulation.
    h = jnp.dot(x, w1_ref[...], preferred_element_type=jnp.float32) + b1_ref[...]
    # Sigmoid via a single EUP tanh push per vreg: sigmoid(z) = 0.5*tanh(z/2)+0.5
    h = 0.5 * jnp.tanh(0.5 * h) + 0.5
    # Output layer has N=1: VPU broadcast-mul + cross-lane reduction instead of a
    # 1/128-wide MXU pass.  Padded hidden lanes equal sigmoid(0)=0.5, but the
    # matching w2 pad entries are zero, so they contribute nothing.
    y = jnp.sum(h * w2_ref[...], axis=-1, keepdims=True) + b2_ref[...]
    o_ref[...] = (0.5 * jnp.tanh(0.5 * y) + 0.5).astype(o_ref.dtype)


@functools.partial(jax.jit, static_argnames=("tb",))
def network_forward(x, w1_t, b1, w2_t, b2, *, tb=4096):
    """Forward pass of Network: sigmoid(sigmoid(x @ W1^T + b1) @ W2^T + b2).

    x:    (B, 198) float32
    w1_t: (198, 80)  (torch (out, in) weight pre-transposed to (in, out))
    b1:   (1, 80) or (80,)
    w2_t: (80, 1)
    b2:   (1, 1) or (1,)
    """
    B = x.shape[0]
    # Batch tile: multiple of 8 sublanes, capped at `tb`.  No batch padding of x:
    # the last grid step uses a partial block (output rows past B are masked).
    TB = max(8, min(tb, ((B + 7) // 8) * 8))
    n_tiles = pl.cdiv(B, TB)

    f32 = jnp.float32
    bf16 = jnp.bfloat16

    # Weights are tiny (~50 KiB total): pad HID 80 -> 128 lanes with zeros.
    # Zero W1 pad columns -> pre-activation 0 in pad lanes -> sigmoid = 0.5,
    # but the matching w2 pad entries are zero, so the contribution is 0.
    w1p = jnp.zeros((IN_DIM, HID_PAD), bf16).at[:, :HID_DIM].set(w1_t.astype(bf16))
    b1p = jnp.zeros((1, HID_PAD), f32).at[:, :HID_DIM].set(
        jnp.asarray(b1, f32).reshape(1, HID_DIM))
    w2p = jnp.zeros((1, HID_PAD), f32).at[:, :HID_DIM].set(
        jnp.asarray(w2_t, f32).reshape(1, HID_DIM))
    b2p = jnp.asarray(b2, f32).reshape(1, 1)

    cost = pl.CostEstimate(
        flops=2 * B * IN_DIM * HID_DIM + 2 * B * HID_DIM,
        transcendentals=B * (HID_PAD + 1),
        bytes_accessed=B * (IN_DIM * 4 + OUT_DIM * 4) + IN_DIM * HID_PAD * 2,
    )

    out = pl.pallas_call(
        network_kernel,
        out_shape=jax.ShapeDtypeStruct((B, OUT_DIM), f32),
        grid=(n_tiles,),
        in_specs=[
            pl.BlockSpec((TB, IN_DIM), lambda i: (i, 0)),        # x: streamed per tile
            pl.BlockSpec((IN_DIM, HID_PAD), lambda i: (0, 0)),   # w1: VMEM-resident
            pl.BlockSpec((1, HID_PAD), lambda i: (0, 0)),        # b1: VMEM-resident
            pl.BlockSpec((1, HID_PAD), lambda i: (0, 0)),        # w2 row
            pl.BlockSpec((1, 1), lambda i: (0, 0)),              # b2
        ],
        out_specs=pl.BlockSpec((TB, OUT_DIM), lambda i: (i, 0)),
        compiler_params=pltpu.CompilerParams(
            dimension_semantics=("parallel",)),   # megacore sharding on v7x
        cost_estimate=cost,
    )(x, w1p, b1p, w2p, b2p)
    return out


def init_params(key):
    """Deterministic init mimicking torch.nn.Linear defaults:
    U(-1/sqrt(fan_in), 1/sqrt(fan_in)) for both weights and biases."""
    k1, k2, k3, k4 = jax.random.split(key, 4)
    bound1 = 1.0 / (IN_DIM ** 0.5)
    bound2 = 1.0 / (HID_DIM ** 0.5)
    # torch stores (out, in); we keep the transposed (in, out) layout.
    w1_t = jax.random.uniform(k1, (IN_DIM, HID_DIM), jnp.float32, -bound1, bound1)
    b1 = jax.random.uniform(k2, (1, HID_DIM), jnp.float32, -bound1, bound1)
    w2_t = jax.random.uniform(k3, (HID_DIM, OUT_DIM), jnp.float32, -bound2, bound2)
    b2 = jax.random.uniform(k4, (1, OUT_DIM), jnp.float32, -bound2, bound2)
    return w1_t, b1, w2_t, b2


def reference_forward(x, w1_t, b1, w2_t, b2):
    h = jax.nn.sigmoid(x @ w1_t + b1)
    return jax.nn.sigmoid(h @ w2_t + b2)


if __name__ == "__main__":
    # TODO(synk): only Network.forward is a kernel; the TD(lambda) training loop,
    # eligibility traces, BackGammon env and input_dice_rolls are host-side logic.
    key = jax.random.PRNGKey(0)
    k_x, k_p, k_x2 = jax.random.split(key, 3)

    w1_t, b1, w2_t, b2 = init_params(k_p)

    # small check (single partial block: B=2 < TB=8)
    batch = 2
    x = jax.random.normal(k_x, (batch, IN_DIM), jnp.float32)
    out = jax.block_until_ready(network_forward(x, w1_t, b1, w2_t, b2))
    ref = reference_forward(x, w1_t, b1, w2_t, b2)
    assert out.shape == (batch, OUT_DIM)
    # bf16 x/W1 on the MXU vs f32 reference -> relaxed tolerance
    assert jnp.allclose(out, ref, atol=5e-3, rtol=5e-3), "mismatch vs JAX reference"

    # multi-tile check (exercises the batch grid + partial last block path)
    batch2 = 300
    x2 = jax.random.normal(k_x2, (batch2, IN_DIM), jnp.float32)
    out2 = jax.block_until_ready(network_forward(x2, w1_t, b1, w2_t, b2, tb=128))
    ref2 = reference_forward(x2, w1_t, b1, w2_t, b2)
    assert out2.shape == (batch2, OUT_DIM)
    assert jnp.allclose(out2, ref2, atol=5e-3, rtol=5e-3), "mismatch (tiled path)"

    print("KERNEL_OK")
</pallas_src>

<mosaic_0001>
module attributes {stable_mosaic.version = 11 : i64} {
  func.func @network_kernel(%arg0: i32, %arg1: memref<8x198xf32, #tpu.memory_space<vmem>>, %arg2: memref<198x128xbf16, #tpu.memory_space<vmem>>, %arg3: memref<1x128xf32, #tpu.memory_space<vmem>>, %arg4: memref<1x128xf32, #tpu.memory_space<vmem>>, %arg5: memref<1x1xf32, #tpu.memory_space<vmem>>, %arg6: memref<8x1xf32, #tpu.memory_space<vmem>>) attributes {dimension_semantics = [#tpu.dimension_semantics<parallel>], iteration_bounds = array<i64: 1>, scalar_prefetch = 0 : i64, scratch_operands = 0 : i64, tpu.core_type = #tpu.core_type<tc>, window_params = [{transform_indices = @transform_0, window_bounds = array<i64: 8, 198>}, {pipeline_mode = #tpu.pipeline_mode<synchronous>, transform_indices = @transform_1, window_bounds = array<i64: 198, 128>}, {pipeline_mode = #tpu.pipeline_mode<synchronous>, transform_indices = @transform_2, window_bounds = array<i64: 1, 128>}, {pipeline_mode = #tpu.pipeline_mode<synchronous>, transform_indices = @transform_3, window_bounds = array<i64: 1, 128>}, {pipeline_mode = #tpu.pipeline_mode<synchronous>, transform_indices = @transform_4, window_bounds = array<i64: 1, 1>}, {transform_indices = @transform_5, window_bounds = array<i64: 8, 1>}]} {
    %c0 = arith.constant 0 : index
    %c0_0 = arith.constant 0 : index
    %0 = vector.load %arg1[%c0, %c0_0] : memref<8x198xf32, #tpu.memory_space<vmem>>, vector<8x198xf32>
    %1 = arith.truncf %0 : vector<8x198xf32> to vector<8x198xbf16>
    %c0_1 = arith.constant 0 : index
    %c0_2 = arith.constant 0 : index
    %2 = vector.load %arg2[%c0_1, %c0_2] : memref<198x128xbf16, #tpu.memory_space<vmem>>, vector<198x128xbf16>
    %cst = arith.constant dense<0.000000e+00> : vector<8x128xf32>
    %3 = tpu.matmul %1, %2, %cst {dimension_numbers = #tpu.dot_dimension_numbers<[1], [0], [0], [1], [0, 0, 1, 1], [], []>} : vector<8x198xbf16>, vector<198x128xbf16>, vector<8x128xf32> -> vector<8x128xf32>
    %c0_3 = arith.constant 0 : index
    %c0_4 = arith.constant 0 : index
    %4 = vector.load %arg3[%c0_3, %c0_4] : memref<1x128xf32, #tpu.memory_space<vmem>>, vector<1x128xf32>
    %5 = vector.broadcast %4 : vector<1x128xf32> to vector<8x128xf32>
    %6 = arith.addf %3, %5 : vector<8x128xf32>
    %cst_5 = arith.constant 5.000000e-01 : f32
    %7 = vector.broadcast %cst_5 : f32 to vector<8x128xf32>
    %8 = arith.mulf %7, %6 : vector<8x128xf32>
    %9 = math.tanh %8 : vector<8x128xf32>
    %cst_6 = arith.constant 5.000000e-01 : f32
    %10 = vector.broadcast %cst_6 : f32 to vector<8x128xf32>
    %11 = arith.mulf %10, %9 : vector<8x128xf32>
    %cst_7 = arith.constant 5.000000e-01 : f32
    %12 = vector.broadcast %cst_7 : f32 to vector<8x128xf32>
    %13 = arith.addf %11, %12 : vector<8x128xf32>
    %c0_8 = arith.constant 0 : index
    %c0_9 = arith.constant 0 : index
    %14 = vector.load %arg4[%c0_8, %c0_9] : memref<1x128xf32, #tpu.memory_space<vmem>>, vector<1x128xf32>
    %15 = vector.broadcast %14 : vector<1x128xf32> to vector<8x128xf32>
    %16 = arith.mulf %13, %15 : vector<8x128xf32>
    %cst_10 = arith.constant dense<0.000000e+00> : vector<8xf32>
    %17 = vector.multi_reduction <add>, %16, %cst_10 [1] : vector<8x128xf32> to vector<8xf32>
    %18 = vector.shape_cast %17 : vector<8xf32> to vector<8x1xf32>
    %c0_11 = arith.constant 0 : index
    %c0_12 = arith.constant 0 : index
    %19 = vector.load %arg5[%c0_11, %c0_12] : memref<1x1xf32, #tpu.memory_space<vmem>>, vector<1x1xf32>
    %20 = vector.broadcast %19 : vector<1x1xf32> to vector<8x1xf32>
    %21 = arith.addf %18, %20 : vector<8x1xf32>
    %cst_13 = arith.constant 5.000000e-01 : f32
    %22 = vector.broadcast %cst_13 : f32 to vector<8x1xf32>
    %23 = arith.mulf %22, %21 : vector<8x1xf32>
    %24 = math.tanh %23 : vector<8x1xf32>
    %cst_14 = arith.constant 5.000000e-01 : f32
    %25 = vector.broadcast %cst_14 : f32 to vector<8x1xf32>
    %26 = arith.mulf %25, %24 : vector<8x1xf32>
    %cst_15 = arith.constant 5.000000e-01 : f32
    %27 = vector.broadcast %cst_15 : f32 to vector<8x1xf32>
    %28 = arith.addf %26, %27 : vector<8x1xf32>
    %c0_16 = arith.constant 0 : index
    %c0_17 = arith.constant 0 : index
    %29 = vector.load %arg6[%c0_16, %c0_17] : memref<8x1xf32, #tpu.memory_space<vmem>>, vector<8x1xf32>
    tpu.vector_store %arg6[%c0_16, %c0_17], %28 {strides = array<i32>} : memref<8x1xf32, #tpu.memory_space<vmem>>, vector<8x1xf32>,
    return
  }
  func.func @transform_0(%arg0: i32) -> (i32, i32) {
    %c0_i32 = arith.constant 0 : i32
    %c0_i32_0 = arith.constant 0 : i32
    return %arg0, %c0_i32 : i32, i32
  }
  func.func @transform_1(%arg0: i32) -> (i32, i32) {
    %c0_i32 = arith.constant 0 : i32
    %c0_i32_0 = arith.constant 0 : i32
    %c0_i32_1 = arith.constant 0 : i32
    return %c0_i32, %c0_i32_0 : i32, i32
  }
  func.func @transform_2(%arg0: i32) -> (i32, i32) {
    %c0_i32 = arith.constant 0 : i32
    %c0_i32_0 = arith.constant 0 : i32
    %c0_i32_1 = arith.constant 0 : i32
    return %c0_i32, %c0_i32_0 : i32, i32
  }
  func.func @transform_3(%arg0: i32) -> (i32, i32) {
    %c0_i32 = arith.constant 0 : i32
    %c0_i32_0 = arith.constant 0 : i32
    %c0_i32_1 = arith.constant 0 : i32
    return %c0_i32, %c0_i32_0 : i32, i32
  }
  func.func @transform_4(%arg0: i32) -> (i32, i32) {
    %c0_i32 = arith.constant 0 : i32
    %c0_i32_0 = arith.constant 0 : i32
    %c0_i32_1 = arith.constant 0 : i32
    return %c0_i32, %c0_i32_0 : i32, i32
  }
  func.func @transform_5(%arg0: i32) -> (i32, i32) {
    %c0_i32 = arith.constant 0 : i32
    %c0_i32_0 = arith.constant 0 : i32
    return %arg0, %c0_i32 : i32, i32
  }
}

</mosaic_0001>

<bundles_post_ra>
// kernel: network_forward.1
= control target key start
LH: loop header
LB: loop body
LE: loop exit
PB: predicated region body
PF: predicated region fallthrough
CT: control target
= control target key end

     0   :  { %s403_s0 = inlined_call_operand.vmem [shape: f32[2,198], index: 0, kind: input, shape index: {}]   ;;  %s404_s1 = inlined_call_operand.vmem [shape: bf16[198,128], index: 1, kind: input, shape index: {}]   ;;  %s405_s2 = inlined_call_operand.vmem [shape: f32[1,128], index: 2, kind: input, shape index: {}]   ;;  %s406_s3 = inlined_call_operand.vmem [shape: f32[1,128], index: 3, kind: input, shape index: {}]   ;;  %s407_s4 = inlined_call_operand.<no memory space> [shape: f32[1,1], index: 4, kind: input, shape index: {}]   ;;  %s408_s5 = inlined_call_operand.vmem [shape: f32[2,1], index: 5, kind: output, shape index: {}]  }
   0x1   :  { %v10_v0 = vstv %s407_s4 }
   0x2   :  { %11 = vst [vmem:[#allocation2] sm:$0x1] %v10_v0 }
   0x3   :  { %v294_v1 = vld [vmem:[%s404_s1] sm:$0xff]   ;;  %v315_v2 = vmov 0   ;;  %v295_v3 = vld [vmem:[%s404_s1 + $0x8] sm:$0xff]   ;;  %v296_v4 = vld [vmem:[%s404_s1 + $0x10] sm:$0xff]   ;;  %vm160_vm0 = vcmask 572416   ;;  %vm164_vm1 = vcmask 1042432  }
   0x4   :  { %168 = vmatprep.subr.bf16.mxu0 %v315_v2  ;;  %v297_v5 = vld [vmem:[%s404_s1 + $0x18] sm:$0xff]   ;;  %v298_v6 = vld [vmem:[%s404_s1 + $0x20] sm:$0xff]   ;;  %v314_v8 = vld.sshfl [vmem:[%s403_s0 + $0x8] sm:$0xff pattern:$0x76325410]  ;;  %vm234_vm2 = vcmask 7168  }
   0x5   :  { %169 = vmatpush1.bf16.msra.mxu0 %v294_v1  ;;  %v313_v7 = vld.sshfl [vmem:[%s403_s0] sm:$0xff pattern:$0x76325410]  ;;  %v299_v9 = vld [vmem:[%s404_s1 + $0x28] sm:$0xff]   ;;  %v300_v10 = vld [vmem:[%s404_s1 + $0x30] sm:$0xff]  }
   0x6   :  { %170 = vmatprep.subr.bf16.mxu0 %v315_v2  ;;  %v48_v11 = vcombine.high %v313_v7, %v314_v8  ;;  %v301_v13 = vld [vmem:[%s404_s1 + $0x38] sm:$0xff]   ;;  %v302_v14 = vld [vmem:[%s404_s1 + $0x40] sm:$0xff]   ;;  %v303_v15 = vld [vmem:[%s404_s1 + $0x48] sm:$0xff]   ;;  %v47_v19 = vcombine.low %v313_v7, %v314_v8 }
   0x7   :  { %v304_v16 = vld [vmem:[%s404_s1 + $0x50] sm:$0xff]   ;;  %v305_v17 = vld [vmem:[%s404_s1 + $0x58] sm:$0xff]   ;;  %v306_v18 = vld [vmem:[%s404_s1 + $0x60] ss:$0 sps:$4 sm:$0x77]  }
   0x8   :  { %v52_v12 = vpack.c.bf16 %v48_v11, %v48_v11  ;;  %v166_v20 = vsel %vm164_vm1, %v306_v18, 0  ;;  %v51_v21 = vpack.c.bf16 %v47_v19, %v47_v19  ;;  %v275_v22 = vld [vmem:[%s405_s2] ss:$0 sm:$0xff] }
   0x9   :  { %171 = vmatpush1.bf16.msra.mxu0 %v295_v3  ;;  %v290_v31 = vld [vmem:[%s406_s3] ss:$0 sm:$0xff] }
   0xa   :  { %172 = vmatprep.subr.bf16.mxu0 %v315_v2  ;;  %289 = vmatprep.mubr.msk.bf16.mxu0 %vm160_vm0, %v52_v12  ;;  %v291_v34 = vld [vmem:[#allocation2] ss:$0 sm:$0xff] }
   0xd   :  { %173 = vmatpush1.bf16.msra.mxu0 %v296_v4 }
   0xe   :  { %174 = vmatprep.subr.bf16.mxu0 %v315_v2 }
  0x11   :  { %175 = vmatpush1.bf16.msra.mxu0 %v297_v5 }
  0x12   :  { %176 = vmatprep.subr.bf16.mxu0 %v315_v2 }
  0x15   :  { %177 = vmatpush1.bf16.msra.mxu0 %v298_v6 }
  0x16   :  { %178 = vmatprep.subr.bf16.mxu0 %v315_v2 }
  0x19   :  { %179 = vmatpush1.bf16.msra.mxu0 %v299_v9 }
  0x1a   :  { %180 = vmatprep.subr.bf16.mxu0 %v315_v2 }
  0x1d   :  { %181 = vmatpush1.bf16.msra.mxu0 %v300_v10 }
  0x1e   :  { %182 = vmatprep.subr.bf16.mxu0 %v315_v2 }
  0x21   :  { %183 = vmatpush1.bf16.msra.mxu0 %v301_v13 }
  0x22   :  { %184 = vmatprep.subr.bf16.mxu0 %v315_v2 }
  0x25   :  { %185 = vmatpush1.bf16.msra.mxu0 %v302_v14 }
  0x26   :  { %186 = vmatprep.subr.bf16.mxu0 %v315_v2 }
  0x29   :  { %187 = vmatpush1.bf16.msra.mxu0 %v303_v15 }
  0x2a   :  { %188 = vmatprep.subr.bf16.mxu0 %v315_v2 }
  0x2d   :  { %189 = vmatpush1.bf16.msra.mxu0 %v304_v16 }
  0x2e   :  { %190 = vmatprep.subr.bf16.mxu0 %v315_v2 }
  0x31   :  { %191 = vmatpush1.bf16.msra.mxu0 %v305_v17 }
  0x32   :  { %192 = vmatprep.subr.bf16.mxu0 %v315_v2 }
  0x35   :  { %193 = vmatpush1.bf16.msra.mxu0 %v166_v20 }
  0x38   :  { %201 = vmatmul.mubr.bf16.vlgmr.msra.gmra.mrb[0].mxu0 %v51_v21 }
 0x10b   :  { %v202_v23 = vpop.f32.mrb[0].mxu0 }
 0x10c   :  { %v203_v24 = vadd.f32 %v275_v22, %v202_v23  ;;  %v204_v25 = vpop.f32.mrb[1].mxu0 }
 0x10d   :  { %v205_v26 = vpop.f32.mrb[2].mxu0 }
 0x10e   :  { %v208_v27 = vmul.f32 0.5, %v203_v24  ;;  %v206_v28 = vpop.f32.mrb[3].mxu0 }
 0x110   :  { %309 = vtanh.f32 %v208_v27 }
 0x11a   :  { %v310_v29 = vpop.eup %309 }
 0x11b   :  { %v210_v30 = vmul.f32 0.5, %v310_v29 }
 0x11d   :  { %v211_v32 = vadd.f32 0.5, %v210_v30 }
 0x11f   :  { %v219_v33 = vmul.f32 %v290_v31, %v211_v32 }
 0x121   :  { %220 = vadd.xlane.f32.xlu0 %v219_v33 }
 0x1ae   :  { %v221_v35 = vpop.xlane.xlu0 %220 }
 0x1af   :  { %v229_v36 = vadd.f32 %v291_v34, %v221_v35 }
 0x1b1   :  { %v230_v37 = vmul.f32 0.5, %v229_v36 }
 0x1b3   :  { %311 = vtanh.f32 %v230_v37 }
 0x1bd   :  { %v312_v38 = vpop.eup %311 }
 0x1be   :  { %v232_v39 = vmul.f32 0.5, %v312_v38 }
 0x1c0   :  { %v233_v40 = vadd.f32 0.5, %v232_v39 }
 0x1c2   :  { %235 = vst.msk [vmem:[#allocation3] sm:$0xff] %vm234_vm2, %v233_v40 }
 0x1c9   :  { %v253_v41 = vld [vmem:[#allocation3] sm:$0x3] }
 0x1ca   :  { %254 = vst [vmem:[%s408_s5] sm:$0x3] %v253_v41 }

</bundles_post_ra>
